<compile_context>
chip_gen: v6e
topology: v6e:2x2x1
jax: 0.10.0
libtpu: 0.0.40
codegen_flags: <defaults>
</compile_context>

<pallas_src>
import jax
import jax.numpy as jnp
from jax.experimental import pallas as pl
from jax.experimental.pallas import tpu as pltpu


def _round_up(n: int, m: int) -> int:
    return (n + m - 1) // m * m


def _make_fused_mlp_kernel(num_layers: int, d_last_pad: int, use_bf16_matmul: bool):
    """Kernel refs: (x, w_packed, b_packed, out).

    x_ref: (P, TB)    features on sublanes, batch on lanes
    w_ref: (L, P, P)  zero-padded (D_out, D_in) weights, one slab per layer
    b_ref: (L, P, 1)  zero-padded bias column vectors
    o_ref: (d_last_pad, TB)
    """

    def kernel(x_ref, w_ref, b_ref, o_ref):
        x = x_ref[...]
        for l in range(num_layers):          # static unroll over layers
            w = w_ref[l]                     # (P, P)
            if use_bf16_matmul:
                y = jnp.dot(w.astype(jnp.bfloat16), x.astype(jnp.bfloat16),
                            preferred_element_type=jnp.float32)
            else:
                y = jnp.dot(w, x, preferred_element_type=jnp.float32)
            y = y + b_ref[l]                 # (P, 1) broadcast over batch lanes
            x = jax.nn.sigmoid(y)            # EUP logistic, f32
        o_ref[...] = x[:d_last_pad, :].astype(o_ref.dtype)

    return kernel


def fused_mlp_forward(x, packed_w, packed_b, dims, *, use_bf16_matmul=False):
    """Runs the whole MLP in one fused Pallas kernel.

    x:        (B, D0) float32
    packed_w: (L, P, P) float32, zero-padded weights (row l = layer l)
    packed_b: (L, P, 1) float32, zero-padded biases
    dims:     tuple of layer widths (D0, D1, ..., D_last)
    returns the flattened (B * D_last,) output, matching PyTorch's reshape(-1).
    """
    B, d0 = x.shape
    L, P, _ = packed_w.shape
    d_last = dims[-1]
    d_last_pad = _round_up(d_last, 8)

    # Batch tile: lane-dense (128) once B is large; otherwise take the whole
    # (tiny) batch as a single tile (block == full array dims is always legal).
    TB = 128 if B >= 128 else B
    B_pad = _round_up(B, TB)
    grid = (B_pad // TB,)

    # Transpose + zero-pad input: (P, B_pad) with batch on the lane axis.
    xt = jnp.zeros((P, B_pad), jnp.float32).at[:d0, :B].set(x.T)

    flops = 2 * B * sum(dims[i] * dims[i + 1] for i in range(L))
    transcendentals = B * sum(dims[1:])
    bytes_accessed = 4 * (xt.size + packed_w.size + packed_b.size
                          + d_last_pad * B_pad)

    out = pl.pallas_call(
        _make_fused_mlp_kernel(L, d_last_pad, use_bf16_matmul),
        out_shape=jax.ShapeDtypeStruct((d_last_pad, B_pad), jnp.float32),
        grid=grid,
        in_specs=[
            pl.BlockSpec((P, TB), lambda i: (0, i)),        # x: stream batch tiles
            pl.BlockSpec((L, P, P), lambda i: (0, 0, 0)),   # weights: resident
            pl.BlockSpec((L, P, 1), lambda i: (0, 0, 0)),   # biases: resident
        ],
        out_specs=pl.BlockSpec((d_last_pad, TB), lambda i: (0, i)),
        compiler_params=pltpu.CompilerParams(
            dimension_semantics=("parallel",)),             # batch tiles split across TCs (v7x)
        cost_estimate=pl.CostEstimate(
            flops=flops,
            transcendentals=transcendentals,
            bytes_accessed=bytes_accessed),
    )(xt, packed_w, packed_b)

    # Back to PyTorch layout: (B, D_last) row-major, then flatten.
    return out[:d_last, :B].T.reshape(-1)


def init_params(key, dims):
    """torch.nn.Linear default init: weight (D_out, D_in), bias (D_out,),
    both ~ U(-1/sqrt(D_in), 1/sqrt(D_in))."""
    params = []
    for i in range(len(dims) - 1):
        d_in, d_out = dims[i], dims[i + 1]
        key, kw, kb = jax.random.split(key, 3)
        bound = 1.0 / jnp.sqrt(jnp.float32(d_in))
        w = jax.random.uniform(kw, (d_out, d_in), jnp.float32, -bound, bound)
        b = jax.random.uniform(kb, (d_out,), jnp.float32, -bound, bound)
        params.append((w, b))
    return params


def pack_params(params, dims):
    """Pack all layers into (L, P, P) weights + (L, P, 1) biases, zero-padded
    to P = round_up(max(dims), 8)."""
    P = _round_up(max(dims), 8)
    L = len(params)
    packed_w = jnp.zeros((L, P, P), jnp.float32)
    packed_b = jnp.zeros((L, P, 1), jnp.float32)
    for l, (w, b) in enumerate(params):
        d_out, d_in = w.shape
        packed_w = packed_w.at[l, :d_out, :d_in].set(w)
        packed_b = packed_b.at[l, :d_out, 0].set(b)
    return packed_w, packed_b


def reference_forward(params, x):
    """Pure-JAX reference matching the PyTorch forward."""
    for w, b in params:
        x = jax.nn.sigmoid(x @ w.T + b)
    return x.reshape(-1)


if __name__ == "__main__":
    # Model(*dim) with dim = (32, 64, 16, 8); input x: (batch=4, 32)
    dims = (32, 64, 16, 8)
    batch = 4

    key = jax.random.PRNGKey(0)
    key, kx = jax.random.split(key)
    x = jax.random.normal(kx, (batch, dims[0]), jnp.float32)

    params = init_params(key, dims)
    packed_w, packed_b = pack_params(params, dims)

    ref = jax.block_until_ready(reference_forward(params, x))

    # f32 MXU path (exact-ish): tight tolerance vs. the pure-JAX reference.
    out = fused_mlp_forward(x, packed_w, packed_b, dims)
    out = jax.block_until_ready(out)
    assert out.shape == (batch * dims[-1],), out.shape
    assert bool(jnp.all(jnp.isfinite(out)))
    assert bool(jnp.all((out > 0.0) & (out < 1.0)))
    assert bool(jnp.allclose(out, ref, atol=1e-6, rtol=1e-6))

    # Optional bf16-input MXU path (f32 accumulation) for scaled-up shapes:
    # loosened tolerance per bf16 precision.
    out_bf16 = fused_mlp_forward(x, packed_w, packed_b, dims,
                                 use_bf16_matmul=True)
    out_bf16 = jax.block_until_ready(out_bf16)
    assert out_bf16.shape == (batch * dims[-1],)
    assert bool(jnp.all(jnp.isfinite(out_bf16)))
    assert bool(jnp.allclose(out_bf16, ref, atol=5e-2, rtol=5e-2))

    print("KERNEL_OK")
</pallas_src>

<mosaic_0001>
module attributes {stable_mosaic.version = 11 : i64} {
  func.func @kernel(%arg0: i32, %arg1: memref<64x4xf32, #tpu.memory_space<vmem>>, %arg2: memref<3x64x64xf32, #tpu.memory_space<vmem>>, %arg3: memref<3x64x1xf32, #tpu.memory_space<vmem>>, %arg4: memref<8x4xf32, #tpu.memory_space<vmem>>) attributes {dimension_semantics = [#tpu.dimension_semantics<parallel>], iteration_bounds = array<i64: 1>, scalar_prefetch = 0 : i64, scratch_operands = 0 : i64, tpu.core_type = #tpu.core_type<tc>, window_params = [{transform_indices = @transform_0, window_bounds = array<i64: 64, 4>}, {pipeline_mode = #tpu.pipeline_mode<synchronous>, transform_indices = @transform_1, window_bounds = array<i64: 3, 64, 64>}, {pipeline_mode = #tpu.pipeline_mode<synchronous>, transform_indices = @transform_2, window_bounds = array<i64: 3, 64, 1>}, {transform_indices = @transform_3, window_bounds = array<i64: 8, 4>}]} {
    %c0 = arith.constant 0 : index
    %c0_0 = arith.constant 0 : index
    %0 = vector.load %arg1[%c0, %c0_0] : memref<64x4xf32, #tpu.memory_space<vmem>>, vector<64x4xf32>
    %c0_1 = arith.constant 0 : index
    %c0_2 = arith.constant 0 : index
    %c0_3 = arith.constant 0 : index
    %1 = vector.load %arg2[%c0_1, %c0_2, %c0_3] : memref<3x64x64xf32, #tpu.memory_space<vmem>>, vector<1x64x64xf32>
    %2 = vector.shape_cast %1 : vector<1x64x64xf32> to vector<64x64xf32>
    %cst = arith.constant dense<0.000000e+00> : vector<64x4xf32>
    %3 = tpu.matmul %2, %0, %cst {dimension_numbers = #tpu.dot_dimension_numbers<[1], [0], [0], [1], [0, 0, 1, 1], [], []>} : vector<64x64xf32>, vector<64x4xf32>, vector<64x4xf32> -> vector<64x4xf32>
    %c0_4 = arith.constant 0 : index
    %c0_5 = arith.constant 0 : index
    %c0_6 = arith.constant 0 : index
    %4 = vector.load %arg3[%c0_4, %c0_5, %c0_6] : memref<3x64x1xf32, #tpu.memory_space<vmem>>, vector<1x64x1xf32>
    %5 = vector.shape_cast %4 : vector<1x64x1xf32> to vector<64x1xf32>
    %6 = vector.broadcast %5 : vector<64x1xf32> to vector<64x4xf32>
    %7 = arith.addf %3, %6 : vector<64x4xf32>
    %8 = arith.negf %7 : vector<64x4xf32>
    %9 = math.exp %8 : vector<64x4xf32>
    %cst_7 = arith.constant 1.000000e+00 : f32
    %10 = vector.broadcast %cst_7 : f32 to vector<64x4xf32>
    %11 = arith.addf %10, %9 : vector<64x4xf32>
    %12 = arith.divf %10, %11 : vector<64x4xf32>
    %c1 = arith.constant 1 : index
    %c0_8 = arith.constant 0 : index
    %c0_9 = arith.constant 0 : index
    %13 = vector.load %arg2[%c1, %c0_8, %c0_9] : memref<3x64x64xf32, #tpu.memory_space<vmem>>, vector<1x64x64xf32>
    %14 = vector.shape_cast %13 : vector<1x64x64xf32> to vector<64x64xf32>
    %cst_10 = arith.constant dense<0.000000e+00> : vector<64x4xf32>
    %15 = tpu.matmul %14, %12, %cst_10 {dimension_numbers = #tpu.dot_dimension_numbers<[1], [0], [0], [1], [0, 0, 1, 1], [], []>} : vector<64x64xf32>, vector<64x4xf32>, vector<64x4xf32> -> vector<64x4xf32>
    %c1_11 = arith.constant 1 : index
    %c0_12 = arith.constant 0 : index
    %c0_13 = arith.constant 0 : index
    %16 = vector.load %arg3[%c1_11, %c0_12, %c0_13] : memref<3x64x1xf32, #tpu.memory_space<vmem>>, vector<1x64x1xf32>
    %17 = vector.shape_cast %16 : vector<1x64x1xf32> to vector<64x1xf32>
    %18 = vector.broadcast %17 : vector<64x1xf32> to vector<64x4xf32>
    %19 = arith.addf %15, %18 : vector<64x4xf32>
    %20 = arith.negf %19 : vector<64x4xf32>
    %21 = math.exp %20 : vector<64x4xf32>
    %cst_14 = arith.constant 1.000000e+00 : f32
    %22 = vector.broadcast %cst_14 : f32 to vector<64x4xf32>
    %23 = arith.addf %22, %21 : vector<64x4xf32>
    %24 = arith.divf %22, %23 : vector<64x4xf32>
    %c2 = arith.constant 2 : index
    %c0_15 = arith.constant 0 : index
    %c0_16 = arith.constant 0 : index
    %25 = vector.load %arg2[%c2, %c0_15, %c0_16] : memref<3x64x64xf32, #tpu.memory_space<vmem>>, vector<1x64x64xf32>
    %26 = vector.shape_cast %25 : vector<1x64x64xf32> to vector<64x64xf32>
    %cst_17 = arith.constant dense<0.000000e+00> : vector<64x4xf32>
    %27 = tpu.matmul %26, %24, %cst_17 {dimension_numbers = #tpu.dot_dimension_numbers<[1], [0], [0], [1], [0, 0, 1, 1], [], []>} : vector<64x64xf32>, vector<64x4xf32>, vector<64x4xf32> -> vector<64x4xf32>
    %c2_18 = arith.constant 2 : index
    %c0_19 = arith.constant 0 : index
    %c0_20 = arith.constant 0 : index
    %28 = vector.load %arg3[%c2_18, %c0_19, %c0_20] : memref<3x64x1xf32, #tpu.memory_space<vmem>>, vector<1x64x1xf32>
    %29 = vector.shape_cast %28 : vector<1x64x1xf32> to vector<64x1xf32>
    %30 = vector.broadcast %29 : vector<64x1xf32> to vector<64x4xf32>
    %31 = arith.addf %27, %30 : vector<64x4xf32>
    %32 = arith.negf %31 : vector<64x4xf32>
    %33 = math.exp %32 : vector<64x4xf32>
    %cst_21 = arith.constant 1.000000e+00 : f32
    %34 = vector.broadcast %cst_21 : f32 to vector<64x4xf32>
    %35 = arith.addf %34, %33 : vector<64x4xf32>
    %36 = arith.divf %34, %35 : vector<64x4xf32>
    %37 = vector.extract_strided_slice %36 {offsets = [0, 0], sizes = [8, 4], strides = [1, 1]} : vector<64x4xf32> to vector<8x4xf32>
    %c0_22 = arith.constant 0 : index
    %c0_23 = arith.constant 0 : index
    %38 = vector.load %arg4[%c0_22, %c0_23] : memref<8x4xf32, #tpu.memory_space<vmem>>, vector<8x4xf32>
    tpu.vector_store %arg4[%c0_22, %c0_23], %37 {strides = array<i32>} : memref<8x4xf32, #tpu.memory_space<vmem>>, vector<8x4xf32>,
    return
  }
  func.func @transform_0(%arg0: i32) -> (i32, i32) {
    %c0_i32 = arith.constant 0 : i32
    %c0_i32_0 = arith.constant 0 : i32
    return %c0_i32, %arg0 : i32, i32
  }
  func.func @transform_1(%arg0: i32) -> (i32, i32, i32) {
    %c0_i32 = arith.constant 0 : i32
    %c0_i32_0 = arith.constant 0 : i32
    %c0_i32_1 = arith.constant 0 : i32
    %c0_i32_2 = arith.constant 0 : i32
    return %c0_i32, %c0_i32_0, %c0_i32_1 : i32, i32, i32
  }
  func.func @transform_2(%arg0: i32) -> (i32, i32, i32) {
    %c0_i32 = arith.constant 0 : i32
    %c0_i32_0 = arith.constant 0 : i32
    %c0_i32_1 = arith.constant 0 : i32
    %c0_i32_2 = arith.constant 0 : i32
    return %c0_i32, %c0_i32_0, %c0_i32_1 : i32, i32, i32
  }
  func.func @transform_3(%arg0: i32) -> (i32, i32) {
    %c0_i32 = arith.constant 0 : i32
    %c0_i32_0 = arith.constant 0 : i32
    return %c0_i32, %arg0 : i32, i32
  }
}

</mosaic_0001>

<bundles_post_ra>
// kernel: tpu_custom_call.1
= control target key start
LH: loop header
LB: loop body
LE: loop exit
PB: predicated region body
PF: predicated region fallthrough
CT: control target
= control target key end

     0   :  { %vm78_vm0 = vcmask 523264   ;;  %v968_v2 = vmov 0   ;;  %vm670_vm1 = vcmask 31744   ;;  %s1163_s0 = inlined_call_operand.vmem [shape: f32[64,4], index: 0, kind: input, shape index: {}]   ;;  %s1164_s1 = inlined_call_operand.vmem [shape: f32[3,64,64], index: 1, kind: input, shape index: {}]   ;;  %s1165_s2 = inlined_call_operand.vmem [shape: f32[3,64,1], index: 2, kind: input, shape index: {}]   ;;  %s1166_s3 = inlined_call_operand.vmem [shape: f32[8,4], index: 3, kind: output, shape index: {}]  }
   0x1   :  { %v21_v0 = vld [vmem:[%s1163_s0 + $0x38] sm:$0xff]  ;;  %v20_v1 = vld [vmem:[%s1163_s0 + $0x30] sm:$0xff]  ;;  %898 = vset.pattern.permute.xlu0 %v968_v2  ;;  %899 = vset.pattern.permute.xlu1 %v968_v2  ;;  %v19_v3 = vld [vmem:[%s1163_s0 + $0x28] sm:$0xff] }
   0x2   :  { %797 = vmatprep.subr.mxu0 %v21_v0  ;;  %v22_v4 = vld [vmem:[%s1164_s1] sm:$0xff]  ;;  %v37_v6 = vld [vmem:[%s1165_s2 + $0x38] sm:$0xff]  ;;  %v35_v8 = vld [vmem:[%s1165_s2 + $0x28] sm:$0xff] }
   0x3   :  { %798 = vmatpush3.msra.mxu0 %v21_v0  ;;  %813 = vmatprep.mubr.msk.f32.mxu0 %vm78_vm0, %v22_v4  ;;  %v18_v5 = vld [vmem:[%s1163_s0 + $0x20] sm:$0xff]  ;;  %v17_v7 = vld [vmem:[%s1163_s0 + $0x18] sm:$0xff]  ;;  %v36_v9 = vld [vmem:[%s1165_s2 + $0x30] sm:$0xff] }
   0x4   :  { %799 = vmatprep.subr.mxu0 %v20_v1  ;;  %75 = vperm.xlu0 %898, %v37_v6   ;;  %v16_v10 = vld [vmem:[%s1163_s0 + $0x10] sm:$0xff]  ;;  %v34_v11 = vld [vmem:[%s1165_s2 + $0x20] sm:$0xff]  ;;  %v15_v12 = vld [vmem:[%s1163_s0 + $0x8] sm:$0xff] }
   0x5   :  { %800 = vmatpush3.msra.mxu0 %v20_v1  ;;  %65 = vperm.xlu1 %899, %v35_v8   ;;  %v33_v13 = vld [vmem:[%s1165_s2 + $0x18] sm:$0xff]  ;;  %v14_v14 = vld [vmem:[%s1163_s0] sm:$0xff]  ;;  %v32_v15 = vld [vmem:[%s1165_s2 + $0x10] sm:$0xff] }
   0x6   :  { %801 = vmatprep.subr.mxu0 %v19_v3  ;;  %v23_v16 = vld [vmem:[%s1164_s1 + $0x8] sm:$0xff]  ;;  %v24_v17 = vld [vmem:[%s1164_s1 + $0x10] sm:$0xff]  ;;  %v30_v19 = vld [vmem:[%s1165_s2] sm:$0xff] }
   0x7   :  { %802 = vmatpush3.msra.mxu0 %v19_v3  ;;  %v31_v18 = vld [vmem:[%s1165_s2 + $0x8] sm:$0xff]  ;;  %v25_v20 = vld [vmem:[%s1164_s1 + $0x18] sm:$0xff]  ;;  %v26_v21 = vld [vmem:[%s1164_s1 + $0x20] sm:$0xff] }
   0x8   :  { %803 = vmatprep.subr.mxu0 %v18_v5  ;;  %70 = vperm.xlu0 %898, %v36_v9   ;;  %v707_v22 = vld [vmem:[%s1165_s2 + $0x78] sm:$0xff]  ;;  %v706_v23 = vld [vmem:[%s1165_s2 + $0x70] sm:$0xff]  ;;  %v27_v24 = vld [vmem:[%s1164_s1 + $0x28] sm:$0xff] }
   0x9   :  { %804 = vmatpush3.msra.mxu0 %v18_v5  ;;  %60 = vperm.xlu1 %899, %v34_v11   ;;  %v28_v25 = vld [vmem:[%s1164_s1 + $0x30] sm:$0xff]  ;;  %v705_v26 = vld [vmem:[%s1165_s2 + $0x68] sm:$0xff]  ;;  %v704_v27 = vld [vmem:[%s1165_s2 + $0x60] sm:$0xff] }
   0xa   :  { %805 = vmatprep.subr.mxu0 %v17_v7  ;;  %v29_v28 = vld [vmem:[%s1164_s1 + $0x38] sm:$0xff]  ;;  %v702_v30 = vld [vmem:[%s1165_s2 + $0x50] sm:$0xff]  ;;  %v701_v31 = vld [vmem:[%s1165_s2 + $0x48] sm:$0xff] }
   0xb   :  { %806 = vmatpush3.msra.mxu0 %v17_v7  ;;  %v703_v29 = vld [vmem:[%s1165_s2 + $0x58] sm:$0xff]  ;;  %v700_v32 = vld [vmem:[%s1165_s2 + $0x40] sm:$0xff] }
   0xc   :  { %807 = vmatprep.subr.mxu0 %v16_v10  ;;  %55 = vperm.xlu0 %898, %v33_v13   ;;  %v732_v33 = vld [vmem:[%s1165_s2 + $0x80] sm:$0xff] }
   0xd   :  { %808 = vmatpush3.msra.mxu0 %v16_v10  ;;  %50 = vperm.xlu1 %899, %v32_v15   ;;  %v692_v34 = vld [vmem:[%s1164_s1 + $0x40] sm:$0xff] }
   0xe   :  { %809 = vmatprep.subr.mxu0 %v15_v12  ;;  %841 = vmatprep.mubr.msk.f32.mxu1 %vm78_vm0, %v692_v34  ;;  %v724_v34 = vld [vmem:[%s1164_s1 + $0x80] sm:$0xff] }
   0xf   :  { %810 = vmatpush3.msra.mxu0 %v15_v12 }
  0x10   :  { %811 = vmatprep.subr.mxu0 %v14_v14  ;;  %45 = vperm.xlu0 %898, %v31_v18  }
  0x11   :  { %812 = vmatpush3.msra.mxu0 %v14_v14  ;;  %40 = vperm.xlu1 %899, %v30_v19  }
  0x12   :  { %814 = vmatmul.mubr.msk.f32.vlgmr.msra.gmra.mxu0 %vm78_vm0, %v23_v16 }
  0x13   :  { %816 = vmatprep.mubr.msk.f32.mxu0 %vm78_vm0, %v24_v17 }
  0x14   :  { %311 = vperm.xlu0 %898, %v707_v22  }
  0x15   :  { %306 = vperm.xlu1 %899, %v706_v23  }
  0x16   :  { %817 = vmatmul.mubr.msk.f32.gmra.mxu0 %vm78_vm0, %v25_v20 }
  0x17   :  { %819 = vmatprep.mubr.msk.f32.mxu0 %vm78_vm0, %v26_v21 }
  0x18   :  { %301 = vperm.xlu0 %898, %v705_v26  }
  0x19   :  { %296 = vperm.xlu1 %899, %v704_v27   ;;  %v693_v27 = vld [vmem:[%s1164_s1 + $0x48] sm:$0xff] }
  0x1a   :  { %820 = vmatmul.mubr.msk.f32.gmra.mxu0 %vm78_vm0, %v27_v24 }
  0x1b   :  { %822 = vmatprep.mubr.msk.f32.mxu0 %vm78_vm0, %v28_v25 }
  0x1c   :  { %291 = vperm.xlu0 %898, %v703_v29   ;;  %v695_v29 = vld [vmem:[%s1164_s1 + $0x58] sm:$0xff] }
  0x1d   :  { %286 = vperm.xlu1 %899, %v702_v30   ;;  %v696_v30 = vld [vmem:[%s1164_s1 + $0x60] sm:$0xff] }
  0x1e   :  { %823 = vmatmul.mubr.msk.f32.gmra.mxu0 %vm78_vm0, %v29_v28  ;;  %v694_v28 = vld [vmem:[%s1164_s1 + $0x50] sm:$0xff] }
  0x1f   :  { %869 = vmatprep.mubr.msk.f32.mxu0 %vm78_vm0, %v724_v34 }
  0x20   :  { %281 = vperm.xlu0 %898, %v701_v31   ;;  %v697_v31 = vld [vmem:[%s1164_s1 + $0x68] sm:$0xff] }
  0x21   :  { %276 = vperm.xlu1 %899, %v700_v32   ;;  %v698_v32 = vld [vmem:[%s1164_s1 + $0x70] sm:$0xff] }
  0x24   :  { %511 = vperm.xlu0 %898, %v732_v33   ;;  %v699_v33 = vld [vmem:[%s1164_s1 + $0x78] sm:$0xff] }
  0x7f   :  { %v76_v35 = vpop.permute.xlu0 %75 }
  0x80   :  { %v66_v36 = vpop.permute.xlu1 %65 }
  0x83   :  { %v71_v39 = vpop.permute.xlu0 %70 }
  0x84   :  { %v61_v41 = vpop.permute.xlu1 %60 }
  0x87   :  { %v56_v45 = vpop.permute.xlu0 %55 }
  0x88   :  { %v51_v48 = vpop.permute.xlu1 %50 }
  0x8b   :  { %v46_v58 = vpop.permute.xlu0 %45 }
  0x8c   :  { %v41_v62 = vpop.permute.xlu1 %40 }
  0xd2   :  { %v815_v37 = vpop.f32.mrf.mxu0 }
  0xd3   :  { %v175_v59 = vadd.f32 %v815_v37, %v46_v58  ;;  %v307_v37 = vpop.permute.xlu1 %306 }
  0xd4   :  { %v169_v38 = vpop.f32.mrf.mxu0 }
  0xd5   :  { %v170_v63 = vadd.f32 %v169_v38, %v41_v62  ;;  %v685_v1 = vmul.f32 -1.442695, %v175_v59 }
  0xd6   :  { %v818_v40 = vpop.f32.mrf.mxu0 }
  0xd7   :  { %v185_v51 = vadd.f32 %v818_v40, %v56_v45  ;;  %v684_v2 = vmul.f32 -1.442695, %v170_v63 }
  0xd8   :  { %v179_v42 = vpop.f32.mrf.mxu0 }
  0xd9   :  { %v180_v55 = vadd.f32 %v179_v42, %v51_v48  ;;  %v687_v60 = vmul.f32 -1.442695, %v185_v51  ;;  %v297_v42 = vpop.permute.xlu1 %296 }
  0xda   :  { %v821_v43 = vpop.f32.mrf.mxu0 }
  0xdb   :  { %v195_v44 = vadd.f32 %v821_v43, %v66_v36  ;;  %v686_v0 = vmul.f32 -1.442695, %v180_v55  ;;  %v312_v36 = vpop.permute.xlu0 %311 }
  0xdc   :  { %v189_v46 = vpop.f32.mrf.mxu0 }
  0xdd   :  { %v190_v47 = vadd.f32 %v189_v46, %v61_v41  ;;  %v689_v49 = vmul.f32 -1.442695, %v195_v44 }
  0xde   :  { %v824_v50 = vpop.f32.mrf.mxu0 }
  0xdf   :  { %v205_v52 = vadd.f32 %v824_v50, %v76_v35  ;;  %v688_v53 = vmul.f32 -1.442695, %v190_v47  ;;  %900 = vpow2.f32 %v689_v49  ;;  %v728_v35 = vld [vmem:[%s1164_s1 + $0xa0] sm:$0xff]  ;;  %v302_v40 = vpop.permute.xlu0 %301  ;;  %v287_v49 = vpop.permute.xlu1 %286 }
  0xe0   :  { %v199_v54 = vpop.f32.mrf.mxu0 }
  0xe1   :  { %v691_v56 = vmul.f32 -1.442695, %v205_v52  ;;  %v200_v57 = vadd.f32 %v199_v54, %v71_v39 }
  0xe3   :  { %902 = vpow2.f32 %v691_v56  ;;  %v690_v61 = vmul.f32 -1.442695, %v200_v57  ;;  %v292_v46 = vpop.permute.xlu0 %291  ;;  %v277_v63 = vpop.permute.xlu1 %276 }
  0xe4   :  { %904 = vpow2.f32 %v688_v53 }
  0xe5   :  { %906 = vpow2.f32 %v690_v61 }
  0xe6   :  { %908 = vpow2.f32 %v687_v60 }
  0xe7   :  { %910 = vpow2.f32 %v686_v0  ;;  %v282_v59 = vpop.permute.xlu0 %281 }
  0xe8   :  { %912 = vpow2.f32 %v685_v1 }
  0xe9   :  { %914 = vpow2.f32 %v684_v2 }
  0xec   :  { %v901_v3 = vpop.eup %900 }
  0xed   :  { %v237_v8 = vadd.f32 1.0, %v901_v3 }
  0xf0   :  { %v903_v4 = vpop.eup %902 }
  0xf1   :  { %v905_v5 = vpop.eup %904  ;;  %v239_v6 = vadd.f32 1.0, %v903_v4 }
  0xf2   :  { %v907_v7 = vpop.eup %906  ;;  %v236_v11 = vadd.f32 1.0, %v905_v5 }
  0xf3   :  { %916 = vrcp.f32 %v239_v6  ;;  %v238_v9 = vadd.f32 1.0, %v907_v7  ;;  %v909_v10 = vpop.eup %908 }
  0xf4   :  { %v911_v12 = vpop.eup %910  ;;  %v235_v13 = vadd.f32 1.0, %v909_v10 }
  0xf5   :  { %918 = vrcp.f32 %v238_v9  ;;  %v913_v14 = vpop.eup %912  ;;  %v234_v15 = vadd.f32 1.0, %v911_v12 }
  0xf6   :  { %920 = vrcp.f32 %v237_v8  ;;  %v915_v16 = vpop.eup %914  ;;  %v233_v17 = vadd.f32 1.0, %v913_v14 }
  0xf7   :  { %922 = vrcp.f32 %v236_v11  ;;  %v232_v18 = vadd.f32 1.0, %v915_v16 }
  0xf8   :  { %924 = vrcp.f32 %v235_v13 }
  0xf9   :  { %926 = vrcp.f32 %v234_v15 }
  0xfa   :  { %928 = vrcp.f32 %v233_v17 }
  0xfb   :  { %930 = vrcp.f32 %v232_v18 }
 0x100   :  { %v917_v19 = vpop.eup %916 }
 0x101   :  { %825 = vmatprep.subr.mxu1 %v917_v19 }
 0x102   :  { %v919_v20 = vpop.eup %918  ;;  %826 = vmatpush3.msra.mxu1 %v917_v19 }
 0x103   :  { %827 = vmatprep.subr.mxu1 %v919_v20  ;;  %v921_v21 = vpop.eup %920 }
 0x104   :  { %828 = vmatpush3.msra.mxu1 %v919_v20  ;;  %v923_v22 = vpop.eup %922 }
 0x105   :  { %829 = vmatprep.subr.mxu1 %v921_v21  ;;  %v925_v23 = vpop.eup %924 }
 0x106   :  { %830 = vmatpush3.msra.mxu1 %v921_v21  ;;  %v927_v24 = vpop.eup %926 }
 0x107   :  { %831 = vmatprep.subr.mxu1 %v923_v22  ;;  %v929_v25 = vpop.eup %928 }
 0x108   :  { %832 = vmatpush3.msra.mxu1 %v923_v22  ;;  %v931_v26 = vpop.eup %930 }
 0x109   :  { %833 = vmatprep.subr.mxu1 %v925_v23 }
 0x10a   :  { %834 = vmatpush3.msra.mxu1 %v925_v23 }
 0x10b   :  { %835 = vmatprep.subr.mxu1 %v927_v24 }
 0x10c   :  { %836 = vmatpush3.msra.mxu1 %v927_v24 }
 0x10d   :  { %837 = vmatprep.subr.mxu1 %v929_v25 }
 0x10e   :  { %838 = vmatpush3.msra.mxu1 %v929_v25 }
 0x10f   :  { %839 = vmatprep.subr.mxu1 %v931_v26 }
 0x110   :  { %840 = vmatpush3.msra.mxu1 %v931_v26 }
 0x111   :  { %842 = vmatmul.mubr.msk.f32.vlgmr.msra.gmra.mxu1 %vm78_vm0, %v693_v27 }
 0x112   :  { %844 = vmatprep.mubr.msk.f32.mxu1 %vm78_vm0, %v694_v28  ;;  %v725_v28 = vld [vmem:[%s1164_s1 + $0x88] sm:$0xff] }
 0x115   :  { %845 = vmatmul.mubr.msk.f32.gmra.mxu1 %vm78_vm0, %v695_v29  ;;  %v729_v29 = vld [vmem:[%s1164_s1 + $0xa8] sm:$0xff] }
 0x116   :  { %847 = vmatprep.mubr.msk.f32.mxu1 %vm78_vm0, %v696_v30  ;;  %v726_v30 = vld [vmem:[%s1164_s1 + $0x90] sm:$0xff] }
 0x119   :  { %848 = vmatmul.mubr.msk.f32.gmra.mxu1 %vm78_vm0, %v697_v31  ;;  %v730_v31 = vld [vmem:[%s1164_s1 + $0xb0] sm:$0xff] }
 0x11a   :  { %850 = vmatprep.mubr.msk.f32.mxu1 %vm78_vm0, %v698_v32  ;;  %v727_v32 = vld [vmem:[%s1164_s1 + $0x98] sm:$0xff] }
 0x11d   :  { %851 = vmatmul.mubr.msk.f32.gmra.mxu1 %vm78_vm0, %v699_v33  ;;  %v731_v33 = vld [vmem:[%s1164_s1 + $0xb8] sm:$0xff] }
 0x11e   :  { %875 = vmatprep.mubr.msk.f32.mxu1 %vm78_vm0, %v728_v35 }
 0x1d1   :  { %v843_v38 = vpop.f32.mrf.mxu1 }
 0x1d2   :  { %v410_v60 = vadd.f32 %v843_v38, %v282_v59 }
 0x1d3   :  { %v404_v39 = vpop.f32.mrf.mxu1 }
 0x1d4   :  { %v405_v0 = vadd.f32 %v404_v39, %v277_v63  ;;  %v717_v2 = vmul.f32 -1.442695, %v410_v60 }
 0x1d5   :  { %v846_v41 = vpop.f32.mrf.mxu1 }
 0x1d6   :  { %v420_v52 = vadd.f32 %v846_v41, %v292_v46  ;;  %v716_v3 = vmul.f32 -1.442695, %v405_v0 }
 0x1d7   :  { %v414_v43 = vpop.f32.mrf.mxu1 }
 0x1d8   :  { %v415_v56 = vadd.f32 %v414_v43, %v287_v49  ;;  %v719_v61 = vmul.f32 -1.442695, %v420_v52 }
 0x1d9   :  { %v849_v44 = vpop.f32.mrf.mxu1 }
 0x1da   :  { %v430_v45 = vadd.f32 %v849_v44, %v302_v40  ;;  %v718_v1 = vmul.f32 -1.442695, %v415_v56 }
 0x1db   :  { %v424_v47 = vpop.f32.mrf.mxu1 }
 0x1dc   :  { %v425_v48 = vadd.f32 %v424_v47, %v297_v42  ;;  %v721_v50 = vmul.f32 -1.442695, %v430_v45 }
 0x1dd   :  { %v852_v51 = vpop.f32.mrf.mxu1 }
 0x1de   :  { %v440_v53 = vadd.f32 %v852_v51, %v312_v36  ;;  %v720_v54 = vmul.f32 -1.442695, %v425_v48  ;;  %932 = vpow2.f32 %v721_v50  ;;  %v512_v36 = vpop.permute.xlu0 %511 }
 0x1df   :  { %v434_v55 = vpop.f32.mrf.mxu1 }
 0x1e0   :  { %v723_v57 = vmul.f32 -1.442695, %v440_v53  ;;  %v435_v58 = vadd.f32 %v434_v55, %v307_v37 }
 0x1e2   :  { %934 = vpow2.f32 %v723_v57  ;;  %v722_v62 = vmul.f32 -1.442695, %v435_v58 }
 0x1e3   :  { %936 = vpow2.f32 %v720_v54 }
 0x1e4   :  { %938 = vpow2.f32 %v722_v62 }
 0x1e5   :  { %940 = vpow2.f32 %v719_v61 }
 0x1e6   :  { %942 = vpow2.f32 %v718_v1 }
 0x1e7   :  { %944 = vpow2.f32 %v717_v2 }
 0x1e8   :  { %946 = vpow2.f32 %v716_v3 }
 0x1eb   :  { %v933_v4 = vpop.eup %932 }
 0x1ec   :  { %v472_v9 = vadd.f32 1.0, %v933_v4 }
 0x1ef   :  { %v935_v5 = vpop.eup %934 }
 0x1f0   :  { %v937_v6 = vpop.eup %936  ;;  %v474_v7 = vadd.f32 1.0, %v935_v5 }
 0x1f1   :  { %v939_v8 = vpop.eup %938  ;;  %v471_v12 = vadd.f32 1.0, %v937_v6 }
 0x1f2   :  { %948 = vrcp.f32 %v474_v7  ;;  %v473_v10 = vadd.f32 1.0, %v939_v8  ;;  %v941_v11 = vpop.eup %940 }
 0x1f3   :  { %v943_v13 = vpop.eup %942  ;;  %v470_v14 = vadd.f32 1.0, %v941_v11 }
 0x1f4   :  { %950 = vrcp.f32 %v473_v10  ;;  %v945_v15 = vpop.eup %944  ;;  %v469_v16 = vadd.f32 1.0, %v943_v13 }
 0x1f5   :  { %952 = vrcp.f32 %v472_v9  ;;  %v947_v17 = vpop.eup %946  ;;  %v468_v18 = vadd.f32 1.0, %v945_v15 }
 0x1f6   :  { %954 = vrcp.f32 %v471_v12  ;;  %v467_v19 = vadd.f32 1.0, %v947_v17 }
 0x1f7   :  { %956 = vrcp.f32 %v470_v14 }
 0x1f8   :  { %958 = vrcp.f32 %v469_v16 }
 0x1f9   :  { %960 = vrcp.f32 %v468_v18 }
 0x1fa   :  { %962 = vrcp.f32 %v467_v19 }
 0x1ff   :  { %v949_v20 = vpop.eup %948 }
 0x200   :  { %853 = vmatprep.subr.mxu0 %v949_v20  ;;  %881 = vmatprep.subr.mxu1 %v949_v20 }
 0x201   :  { %v951_v21 = vpop.eup %950  ;;  %854 = vmatpush3.msra.mxu0 %v949_v20  ;;  %889 = vmatpush3.msra.mxu1 %v949_v20 }
 0x202   :  { %855 = vmatprep.subr.mxu0 %v951_v21  ;;  %882 = vmatprep.subr.mxu1 %v951_v21  ;;  %v953_v22 = vpop.eup %952 }
 0x203   :  { %856 = vmatpush3.msra.mxu0 %v951_v21  ;;  %890 = vmatpush3.msra.mxu1 %v951_v21  ;;  %v955_v23 = vpop.eup %954 }
 0x204   :  { %857 = vmatprep.subr.mxu0 %v953_v22  ;;  %883 = vmatprep.subr.mxu1 %v953_v22  ;;  %v957_v24 = vpop.eup %956 }
 0x205   :  { %858 = vmatpush3.msra.mxu0 %v953_v22  ;;  %891 = vmatpush3.msra.mxu1 %v953_v22  ;;  %v959_v25 = vpop.eup %958 }
 0x206   :  { %859 = vmatprep.subr.mxu0 %v955_v23  ;;  %884 = vmatprep.subr.mxu1 %v955_v23  ;;  %v961_v26 = vpop.eup %960 }
 0x207   :  { %860 = vmatpush3.msra.mxu0 %v955_v23  ;;  %892 = vmatpush3.msra.mxu1 %v955_v23  ;;  %v963_v27 = vpop.eup %962 }
 0x208   :  { %861 = vmatprep.subr.mxu0 %v957_v24  ;;  %885 = vmatprep.subr.mxu1 %v957_v24 }
 0x209   :  { %862 = vmatpush3.msra.mxu0 %v957_v24  ;;  %893 = vmatpush3.msra.mxu1 %v957_v24 }
 0x20a   :  { %863 = vmatprep.subr.mxu0 %v959_v25  ;;  %886 = vmatprep.subr.mxu1 %v959_v25 }
 0x20b   :  { %864 = vmatpush3.msra.mxu0 %v959_v25  ;;  %894 = vmatpush3.msra.mxu1 %v959_v25 }
 0x20c   :  { %865 = vmatprep.subr.mxu0 %v961_v26  ;;  %887 = vmatprep.subr.mxu1 %v961_v26 }
 0x20d   :  { %866 = vmatpush3.msra.mxu0 %v961_v26  ;;  %895 = vmatpush3.msra.mxu1 %v961_v26 }
 0x20e   :  { %867 = vmatprep.subr.mxu0 %v963_v27  ;;  %888 = vmatprep.subr.mxu1 %v963_v27 }
 0x20f   :  { %868 = vmatpush3.msra.mxu0 %v963_v27  ;;  %896 = vmatpush3.msra.mxu1 %v963_v27 }
 0x210   :  { %870 = vmatmul.mubr.msk.f32.vlgmr.msra.gmra.mxu0 %vm78_vm0, %v725_v28  ;;  %876 = vmatmul.mubr.msk.f32.vlgmr.msra.gmra.mxu1 %vm78_vm0, %v729_v29 }
 0x211   :  { %872 = vmatprep.mubr.msk.f32.mxu0 %vm78_vm0, %v726_v30  ;;  %878 = vmatprep.mubr.msk.f32.mxu1 %vm78_vm0, %v730_v31 }
 0x214   :  { %873 = vmatmul.mubr.msk.f32.gmra.mxu0 %vm78_vm0, %v727_v32  ;;  %879 = vmatmul.mubr.msk.f32.gmra.mxu1 %vm78_vm0, %v731_v33 }
 0x2d0   :  { %v871_v34 = vpop.f32.mrf.mxu0  ;;  %v877_v35 = vpop.f32.mrf.mxu1 }
 0x2d2   :  { %v632_v37 = vpop.f32.mrf.mxu0  ;;  %v649_v38 = vpop.f32.mrf.mxu1 }
 0x2d3   :  { %v633_v39 = vadd.f32 %v632_v37, %v512_v36 }
 0x2d4   :  { %v874_v40 = vpop.f32.mrf.mxu0  ;;  %v880_v41 = vpop.f32.mrf.mxu1 }
 0x2d5   :  { %v748_v42 = vmul.f32 -1.442695, %v633_v39 }
 0x2d6   :  { %v641_v43 = vpop.f32.mrf.mxu0  ;;  %v657_v44 = vpop.f32.mrf.mxu1 }
 0x2d7   :  { %964 = vpow2.f32 %v748_v42 }
 0x2e4   :  { %v965_v45 = vpop.eup %964 }
 0x2e5   :  { %v667_v46 = vadd.f32 1.0, %v965_v45 }
 0x2e7   :  { %966 = vrcp.f32 %v667_v46 }
 0x2f4   :  { %v967_v47 = vpop.eup %966 }
 0x2f5   :  { %671 = vst.msk [vmem:[%s1166_s3] sm:$0xff] %vm670_vm1, %v967_v47 }

</bundles_post_ra>
